<compile_context>
chip_gen: v7x
topology: tpu7x:2x2x1
jax: 0.10.0
libtpu: 0.0.40
codegen_flags: <defaults>
</compile_context>

<pallas_src>
import functools

import jax
import jax.numpy as jnp
from jax.experimental import pallas as pl
from jax.experimental.pallas import tpu as pltpu


# --------------------------------------------------------------------------
# Kernel 1: hoisted input projection (one GEMM per direction).
#   gates[d] = x[d] @ W_ih[d] + (b_ih[d] + [b_hr, b_hz, 0])
# --------------------------------------------------------------------------
def input_proj_kernel(x_ref, w_ref, b_ref, g_ref):
    g_ref[...] = (
        jnp.dot(x_ref[...], w_ref[...], preferred_element_type=jnp.float32)
        + b_ref[...]
    )


# --------------------------------------------------------------------------
# Kernel 2: recurrent part. Per grid step: one direction, one chunk of
# timesteps, walked with an unrolled fori_loop. Only h @ W_hh per step.
# --------------------------------------------------------------------------
def gru_recurrent_kernel(len_ref, gates_ref, whh_ref, bhhn_ref,
                         out_ref, hid_ref, h_scr,
                         *, hidden_size, seq_len, chunk):
    H = hidden_size
    d = pl.program_id(0)            # direction: 0 = forward, 1 = backward
    c = pl.program_id(1)            # time chunk
    nc = pl.num_programs(1)

    @pl.when(c == 0)
    def _():
        h_scr[...] = jnp.zeros_like(h_scr)

    lens = len_ref[...]             # (B, 1) int32
    whh = whh_ref[...]              # (H, 3H)
    bhh_n = bhhn_ref[...]           # (1, H)

    def step(j, h):
        p = c * chunk + j                               # processing index
        t = (1 - d) * p + d * (seq_len - 1 - p)          # real time index
        g = gates_ref[j]                                 # (B, 3H) precomputed
        gh = jnp.dot(h, whh, preferred_element_type=jnp.float32)  # (B, 3H)
        r = jax.nn.sigmoid(g[:, :H] + gh[:, :H])
        z = jax.nn.sigmoid(g[:, H:2 * H] + gh[:, H:2 * H])
        n = jnp.tanh(g[:, 2 * H:] + r * (gh[:, 2 * H:] + bhh_n))
        h_new = (1.0 - z) * n + z * h
        mask = t < lens                                  # (B, 1) bool
        h_upd = jnp.where(mask, h_new, h)
        out_ref[j] = jnp.where(mask, h_upd, 0.0)         # write-once per step
        return h_upd

    unroll = True if chunk <= 32 else 8
    h_final = jax.lax.fori_loop(0, chunk, step, h_scr[...], unroll=unroll)
    h_scr[...] = h_final

    @pl.when(c == nc - 1)
    def _():
        hid_ref[...] = h_scr[...]


# --------------------------------------------------------------------------
# Wrapper
# --------------------------------------------------------------------------
def encoder_forward(input_seq, input_lengths, emb_weight, gru_params,
                    hidden_size, time_chunk=None):
    """input_seq: (T, B) int32; input_lengths: (B,) int32.
    Returns (outputs (T,B,H), hidden (2,B,H)) matching the PyTorch Encoder."""
    T, B = input_seq.shape
    H = hidden_size
    wih_f, whh_f, bih_f, bhh_f, wih_b, whh_b, bih_b, bhh_b = gru_params

    # Embedding lookup (gather) stays in glue JAX.
    embedded = jnp.take(emb_weight, input_seq, axis=0).astype(jnp.float32)  # (T,B,H)
    lens = input_lengths.astype(jnp.int32).reshape(B, 1)

    # Stack per-direction params; time-reverse the embedding for the backward
    # direction so the recurrent kernel always walks processing order 0..T-1.
    x2 = jnp.stack([embedded, embedded[::-1]], axis=0).reshape(2, T * B, H)
    wih = jnp.stack([wih_f, wih_b], axis=0)       # (2, H, 3H)
    whh = jnp.stack([whh_f, whh_b], axis=0)       # (2, H, 3H)
    bih = jnp.stack([bih_f, bih_b], axis=0)       # (2, 1, 3H)
    bhh = jnp.stack([bhh_f, bhh_b], axis=0)       # (2, 1, 3H)
    # Fold b_ih and the r/z parts of b_hh into the hoisted projection.
    bias_fold = bih + jnp.concatenate(
        [bhh[:, :, :2 * H], jnp.zeros_like(bhh[:, :, 2 * H:])], axis=-1)
    bhh_n = bhh[:, :, 2 * H:]                     # (2, 1, H)

    cparams_proj = pltpu.CompilerParams(
        dimension_semantics=("parallel",),
        vmem_limit_bytes=32 * 1024 * 1024)

    # ---- hoisted input projection: one big GEMM per direction ----
    gates = pl.pallas_call(
        input_proj_kernel,
        out_shape=jax.ShapeDtypeStruct((2, T * B, 3 * H), jnp.float32),
        grid=(2,),
        in_specs=[
            pl.BlockSpec((None, T * B, H), lambda d: (d, 0, 0)),
            pl.BlockSpec((None, H, 3 * H), lambda d: (d, 0, 0)),
            pl.BlockSpec((None, 1, 3 * H), lambda d: (d, 0, 0)),
        ],
        out_specs=pl.BlockSpec((None, T * B, 3 * H), lambda d: (d, 0, 0)),
        compiler_params=cparams_proj,
    )(x2, wih, bias_fold)
    gates = gates.reshape(2, T, B, 3 * H)         # [1] is already time-reversed

    # ---- recurrent kernel ----
    chunk = time_chunk if time_chunk is not None else T
    assert T % chunk == 0, "T must be divisible by the time chunk"
    nchunks = T // chunk

    kernel = functools.partial(
        gru_recurrent_kernel, hidden_size=H, seq_len=T, chunk=chunk)

    out_proc, hidden = pl.pallas_call(
        kernel,
        out_shape=(jax.ShapeDtypeStruct((2, T, B, H), jnp.float32),
                   jax.ShapeDtypeStruct((2, B, H), jnp.float32)),
        grid=(2, nchunks),
        in_specs=[
            pl.BlockSpec((B, 1), lambda d, c: (0, 0)),                      # lengths
            pl.BlockSpec((None, chunk, B, 3 * H), lambda d, c: (d, c, 0, 0)),  # gates
            pl.BlockSpec((None, H, 3 * H), lambda d, c: (d, 0, 0)),         # W_hh^T
            pl.BlockSpec((None, 1, H), lambda d, c: (d, 0, 0)),             # b_hh (n gate)
        ],
        out_specs=(
            pl.BlockSpec((None, chunk, B, H), lambda d, c: (d, c, 0, 0)),   # per-dir outputs
            pl.BlockSpec((None, B, H), lambda d, c: (d, 0, 0)),             # final hidden
        ),
        scratch_shapes=[pltpu.VMEM((B, H), jnp.float32)],
        compiler_params=pltpu.CompilerParams(
            dimension_semantics=("parallel", "arbitrary"),
            vmem_limit_bytes=32 * 1024 * 1024),
    )(lens, gates, whh, bhh_n)

    # Backward direction was produced in reversed (processing) order; un-reverse
    # and sum the two directions (outputs[:, :, :H] + outputs[:, :, H:]).
    outputs = out_proc[0] + out_proc[1][::-1]
    return outputs, hidden


# --------------------------------------------------------------------------
# Pure-JAX reference mirroring PyTorch packed bidirectional GRU semantics.
# --------------------------------------------------------------------------
def encoder_reference(input_seq, input_lengths, emb_weight, gru_params, hidden_size):
    H = hidden_size
    wih_f, whh_f, bih_f, bhh_f, wih_b, whh_b, bih_b, bhh_b = gru_params
    embedded = jnp.take(emb_weight, input_seq, axis=0).astype(jnp.float32)
    T, B, _ = embedded.shape
    lens = input_lengths.astype(jnp.int32)

    def cell(x, h, wih, whh, bih, bhh):
        gi = x @ wih + bih
        gh = h @ whh + bhh
        r = jax.nn.sigmoid(gi[:, :H] + gh[:, :H])
        z = jax.nn.sigmoid(gi[:, H:2 * H] + gh[:, H:2 * H])
        n = jnp.tanh(gi[:, 2 * H:] + r * gh[:, 2 * H:])
        return (1.0 - z) * n + z * h

    def make_step(wih, whh, bih, bhh):
        def step(h, inp):
            x, t = inp
            hn = cell(x, h, wih, whh, bih, bhh)
            mask = (t < lens)[:, None]
            h2 = jnp.where(mask, hn, h)
            return h2, jnp.where(mask, h2, 0.0)
        return step

    h0 = jnp.zeros((B, H), jnp.float32)
    ts = jnp.arange(T)
    h_f, outs_f = jax.lax.scan(make_step(wih_f, whh_f, bih_f, bhh_f), h0, (embedded, ts))
    h_b, outs_b_rev = jax.lax.scan(make_step(wih_b, whh_b, bih_b, bhh_b), h0,
                                   (embedded[::-1], ts[::-1]))
    outs = outs_f + outs_b_rev[::-1]
    hidden = jnp.stack([h_f, h_b], axis=0)
    return outs, hidden


if __name__ == "__main__":
    # Lane/sublane-aligned small shapes: H multiple of 128, B multiple of 8.
    T, B, H, VOCAB = 8, 8, 128, 20

    key = jax.random.PRNGKey(0)
    k_emb, k_seq, kf1, kf2, kf3, kf4, kb1, kb2, kb3, kb4 = jax.random.split(key, 10)

    # nn.Embedding(VOCAB, H): normal(0, 1)
    emb_weight = jax.random.normal(k_emb, (VOCAB, H), jnp.float32)

    # nn.GRU params, uniform(-1/sqrt(H), 1/sqrt(H)); stored pre-transposed as (H, 3H)
    k = 1.0 / (H ** 0.5)
    u = lambda kk, shape: jax.random.uniform(kk, shape, jnp.float32, -k, k)
    gru_params = (
        u(kf1, (H, 3 * H)), u(kf2, (H, 3 * H)), u(kf3, (1, 3 * H)), u(kf4, (1, 3 * H)),  # fwd
        u(kb1, (H, 3 * H)), u(kb2, (H, 3 * H)), u(kb3, (1, 3 * H)), u(kb4, (1, 3 * H)),  # bwd
    )

    input_seq = jax.random.randint(k_seq, (T, B), 0, VOCAB, jnp.int32)
    # lengths sorted descending, as PyTorch pack_padded_sequence requires
    input_lengths = jnp.array([8, 7, 6, 5, 4, 3, 2, 1], dtype=jnp.int32)

    outputs, hidden = encoder_forward(input_seq, input_lengths, emb_weight, gru_params, H)
    outputs, hidden = jax.block_until_ready((outputs, hidden))

    ref_out, ref_hid = encoder_reference(input_seq, input_lengths, emb_weight, gru_params, H)
    assert jnp.allclose(outputs, ref_out, atol=1e-4), "outputs mismatch"
    assert jnp.allclose(hidden, ref_hid, atol=1e-4), "hidden mismatch"

    # TODO(synk): for bf16 weights (v6e/v7x MXU fast path) loosen tolerance to ~1e-2.
    print("KERNEL_OK")
</pallas_src>

<mosaic_0001>
module attributes {stable_mosaic.version = 11 : i64} {
  func.func @input_proj_kernel(%arg0: i32, %arg1: memref<1x64x128xf32, #tpu.memory_space<vmem>>, %arg2: memref<1x128x384xf32, #tpu.memory_space<vmem>>, %arg3: memref<1x1x384xf32, #tpu.memory_space<vmem>>, %arg4: memref<1x64x384xf32, #tpu.memory_space<vmem>>) attributes {dimension_semantics = [#tpu.dimension_semantics<parallel>], iteration_bounds = array<i64: 2>, scalar_prefetch = 0 : i64, scratch_operands = 0 : i64, tpu.core_type = #tpu.core_type<tc>, window_params = [{transform_indices = @transform_0, window_bounds = array<i64: 1, 64, 128>}, {transform_indices = @transform_1, window_bounds = array<i64: 1, 128, 384>}, {transform_indices = @transform_2, window_bounds = array<i64: 1, 1, 384>}, {transform_indices = @transform_3, window_bounds = array<i64: 1, 64, 384>}]} {
    %c0 = arith.constant 0 : index
    %c0_0 = arith.constant 0 : index
    %c0_1 = arith.constant 0 : index
    %0 = vector.load %arg1[%c0, %c0_0, %c0_1] : memref<1x64x128xf32, #tpu.memory_space<vmem>>, vector<1x64x128xf32>
    %1 = vector.shape_cast %0 : vector<1x64x128xf32> to vector<64x128xf32>
    %c0_2 = arith.constant 0 : index
    %c0_3 = arith.constant 0 : index
    %c0_4 = arith.constant 0 : index
    %2 = vector.load %arg2[%c0_2, %c0_3, %c0_4] : memref<1x128x384xf32, #tpu.memory_space<vmem>>, vector<1x128x384xf32>
    %3 = vector.shape_cast %2 : vector<1x128x384xf32> to vector<128x384xf32>
    %cst = arith.constant dense<0.000000e+00> : vector<64x384xf32>
    %4 = tpu.matmul %1, %3, %cst {dimension_numbers = #tpu.dot_dimension_numbers<[1], [0], [0], [1], [0, 0, 1, 1], [], []>} : vector<64x128xf32>, vector<128x384xf32>, vector<64x384xf32> -> vector<64x384xf32>
    %c0_5 = arith.constant 0 : index
    %c0_6 = arith.constant 0 : index
    %c0_7 = arith.constant 0 : index
    %5 = vector.load %arg3[%c0_5, %c0_6, %c0_7] : memref<1x1x384xf32, #tpu.memory_space<vmem>>, vector<1x1x384xf32>
    %6 = vector.shape_cast %5 : vector<1x1x384xf32> to vector<1x384xf32>
    %7 = vector.broadcast %6 : vector<1x384xf32> to vector<64x384xf32>
    %8 = arith.addf %4, %7 : vector<64x384xf32>
    %c0_8 = arith.constant 0 : index
    %c0_9 = arith.constant 0 : index
    %c0_10 = arith.constant 0 : index
    %9 = vector.load %arg4[%c0_8, %c0_9, %c0_10] : memref<1x64x384xf32, #tpu.memory_space<vmem>>, vector<1x64x384xf32>
    %10 = vector.shape_cast %9 : vector<1x64x384xf32> to vector<64x384xf32>
    %11 = vector.shape_cast %8 : vector<64x384xf32> to vector<1x64x384xf32>
    tpu.vector_store %arg4[%c0_8, %c0_9, %c0_10], %11 {strides = array<i32>} : memref<1x64x384xf32, #tpu.memory_space<vmem>>, vector<1x64x384xf32>,
    return
  }
  func.func @transform_0(%arg0: i32) -> (i32, i32, i32) {
    %c0_i32 = arith.constant 0 : i32
    %c0_i32_0 = arith.constant 0 : i32
    %c0_i32_1 = arith.constant 0 : i32
    return %arg0, %c0_i32, %c0_i32_0 : i32, i32, i32
  }
  func.func @transform_1(%arg0: i32) -> (i32, i32, i32) {
    %c0_i32 = arith.constant 0 : i32
    %c0_i32_0 = arith.constant 0 : i32
    %c0_i32_1 = arith.constant 0 : i32
    return %arg0, %c0_i32, %c0_i32_0 : i32, i32, i32
  }
  func.func @transform_2(%arg0: i32) -> (i32, i32, i32) {
    %c0_i32 = arith.constant 0 : i32
    %c0_i32_0 = arith.constant 0 : i32
    %c0_i32_1 = arith.constant 0 : i32
    return %arg0, %c0_i32, %c0_i32_0 : i32, i32, i32
  }
  func.func @transform_3(%arg0: i32) -> (i32, i32, i32) {
    %c0_i32 = arith.constant 0 : i32
    %c0_i32_0 = arith.constant 0 : i32
    %c0_i32_1 = arith.constant 0 : i32
    return %arg0, %c0_i32, %c0_i32_0 : i32, i32, i32
  }
}

</mosaic_0001>

<bundles_post_ra>
// kernel: tpu_custom_call.1
= control target key start
LH: loop header
LB: loop body
LE: loop exit
PB: predicated region body
PF: predicated region fallthrough
CT: control target
= control target key end

     0   :  { %8 = vsyncpa [#allocation3], 0  ;;  %s1387_s0 = inlined_call_operand.hbm [shape: f32[2,64,128], index: 0, kind: input, shape index: {}]   ;;  %s1388_s1 = inlined_call_operand.hbm [shape: f32[2,128,384], index: 1, kind: input, shape index: {}]   ;;  %s1389_s2 = inlined_call_operand.vmem [shape: f32[2,1,384], index: 2, kind: input, shape index: {}]   ;;  %s1390_s3 = inlined_call_operand.hbm [shape: f32[2,64,384], index: 3, kind: output, shape index: {}]  }
   0x1   :  { %10 = vsyncpa [#allocation3 + $0x1], 0 }
   0x2   :  { %11 = vsyncpa [#allocation6], 0 }
   0x3   :  { %13 = vsyncpa [#allocation6 + $0x1], 0 }
   0x4   :  { %14 = vsyncpa [#allocation4], 0 }
   0x5   :  { %16 = vsyncpa [#allocation4 + $0x1], 0  ;;  %s1054_s12 = smov 0   ;;  %s1056_s13 = smov 0  }
   0x6   :  { %s1058_s14 = smov 0   ;;  %s1060_s15 = smov 0  }
   0x7 LB: > { %s1075_s16 = sadd.s32 4294967295, %s1022_s15   ;;  %s683_s17 = sadd.s32 4294967294, %s1022_s15   ;;  %s1022_s15 = sphi %s1060_s15, %s1406_s15   ;;  %s1018_s14 = sphi %s1058_s14, %s1405_s14   ;;  %s1014_s13 = sphi %s1056_s13, %s1404_s13   ;;  %s1010_s12 = sphi %s1054_s12, %s1403_s12  }
   0x8   : > { %s1079_s18 = sadd.s32 1, %s1022_s15   ;;  %s29_s19 = sadd.s32 1, %s1018_s14 }
   0x9   : > { %s26_s20 = ssub.s32 %s1022_s15, %s1079_s18  ;;  %p36_p0 = scmp.ne.s32.totalorder %s1018_s14, %s1014_s13 }
   0xa   : > { %p27_p1 = scmp.eq.s32.totalorder %s26_s20, 0  ;;  %p37_p2 = scmp.eq.s32.totalorder %s1022_s15, 0 }
   0xb   : > { %p42_p3 = scmp.ne.s32.totalorder %s1014_s13, %s1010_s12  ;;  %p43_p4 = scmp.eq.s32.totalorder %s1075_s16, 0 }
   0xc   : > { %s1091_s21 = scalar_select %p27_p1, %s1018_s14, %s29_s19  }
   0xd   : > { %p1093_p5 = por %p37_p2, %p36_p0  ;;  %p1097_p6 = por %p43_p4, %p42_p3 }
   0xe   : > { %p118_p7 = scmp.eq.s32.totalorder %s1075_s16, 1  ;;  %p124_p8 = scmp.eq.s32.totalorder %s683_s17, 1 }
   0xf   : > { %s1394_s23 = scalar_select %p1097_p6, 1, 0 }
  0x10   : > { %p851_p10 = scmp.lt.s32.totalorder %s1022_s15, 2  ;;  %p1104_p11 = por %p118_p7, %p36_p0 }
  0x11   : > { %p1108_p12 = por %p124_p8, %p42_p3  ;;  %s1113_s26 = sand.u32 1, %s1018_s14  }
  0x12   : > { %s1395_s24 = scalar_select %p1104_p11, 1, 0 }
  0x13   : > { %s1396_s25 = scalar_select %p1108_p12, 1, 0 }
  0x14   : > { %s695_s27 = sshll.u32 %s1022_s15, 10  ;;  %s686_s28 = sshll.u32 %s1113_s26, 6 }
  0x15   : > { %s1120_s4 = scalar_lea.hbm %s1387_s0, %s695_s27  ;;  %s148_s5 = scalar_lea.vmem [#allocation2], %s686_s28 }
  0x16   : > { %s155_s6 = sshll.u32 %s148_s5, 4  ;;  %p1124_p13 = pnand %p851_p10, %p1093_p5  ;;  %s1128_s6 = int_to_ptr.vmem [resolvable:$true] %s155_s6 }
  0x17   : > { %s145_s8 = scalar_lea.sflag [#allocation3], %s1113_s26  ;;  %s892_s9 = scalar_lea.hbm %s1120_s4, 1024 }
  0x18   : > { %p893_p0 = scmp.ne.s32.totalorder %s1120_s4, %s892_s9  ;;  %p894_p1 = pneg %p1124_p13 }
  0x19   : > { %s897_s17 = scalar_lea.hbm %s1387_s0, 2048  ;;  %p898_p4 = scmp.lt.u32.totalorder %s1120_s4, %s1387_s0 }
  0x1a   : > { %p895_p2 = pnand %p894_p1, %p893_p0  ;;  %p899_p5 = scmp.lt.u32.totalorder %s897_s17, %s892_s9 }
  0x1b   : > { %p901_p8 = scmp.lt.u32.totalorder %s892_s9, %s1120_s4 }
  0x1c   : > { %p896_p3 = pneg %p895_p2  ;;  %p900_p7 = por %p899_p5, %p898_p4 }
  0x1e   : > { %p902_p10 = por %p901_p8, %p900_p7 }
  0x20   : > { %p903_p9 = pnand %p902_p10, %p896_p3 }
  0x22   : > { %906 = shalt.err (!%p903_p9)
}
  0x23   : > { %s907_s22 = scalar_lea.vmem %s1128_s6, 1024  ;;  %s1024_s27 = smov [#allocation2]  }
  0x24   : > { %p908_p0 = scmp.ne.s32.totalorder %s1128_s6, %s907_s22  ;;  %s912_s28 = sshll.u32 %s1024_s27, 4  ;;  %s913_s28 = int_to_ptr.vmem [resolvable:$false] %s912_s28 }
  0x25   : > { %s914_s29 = scalar_lea.vmem %s913_s28, 2048  ;;  %p915_p11 = scmp.lt.s32.totalorder %s1128_s6, %s913_s28 }
  0x26   : > { %p910_p2 = pnand %p908_p0, %p894_p1  ;;  %p916_p4 = scmp.lt.s32.totalorder %s914_s29, %s907_s22 }
  0x28   : > { %p911_p12 = pneg %p910_p2  ;;  %p917_p5 = por %p916_p4, %p915_p11 }
  0x2a   : > { %p918_p7 = pnand %p917_p5, %p911_p12 }
  0x2c   : > { %921 = shalt.err (!%p918_p7)
}
  0x2d   : > { %s1025_s30 = smov 128   ;;  %s1026_s5 = smov 8  }
  0x2e   : > { %843 = dma.hbm_to_vmem [thread:$0]  (!%p1124_p13), %s1120_s4, 1024, %s1128_s6, %s145_s8, %s1025_s30, %s1025_s30, %s1026_s5  }
  0x2f   : > { %p690_p9 = scmp.ge.s32.totalorder %s1022_s15, 1  ;;  %p191_p3 = scmp.lt.s32.totalorder %s1022_s15, 3 }
  0x30   : > { %s828_s9 = smul.u32 384, %s1113_s26  ;;  %s166_s4 = scalar_lea.sflag [#allocation6], %s1113_s26 }
  0x31   : > { %p1161_p11 = pnand %p690_p9, %p191_p3  ;;  %s829_s11 = smul.u32 6144, %s1022_s15 }
  0x32   : > { %s169_s22 = scalar_lea.vmem [#allocation5], %s828_s9  ;;  %s927_s29 = scalar_lea.hbm %s1388_s1, 12288 }
  0x33   : > { %s1169_s20 = scalar_lea.hbm %s1388_s1, %s829_s11  ;;  %s176_s27 = sshll.u32 %s169_s22, 4  ;;  %s1171_s27 = int_to_ptr.vmem [resolvable:$true] %s176_s27 }
  0x34   : > { %s922_s6 = scalar_lea.hbm %s1169_s20, 6144  ;;  %p928_p0 = scmp.lt.u32.totalorder %s1169_s20, %s1388_s1 }
  0x35   : > { %p923_p12 = scmp.ne.s32.totalorder %s1169_s20, %s922_s6  ;;  %p929_p2 = scmp.lt.u32.totalorder %s927_s29, %s922_s6 }
  0x36   : > { %p931_p5 = scmp.lt.u32.totalorder %s922_s6, %s1169_s20 }
  0x37   : > { %p925_p8 = pnand %p923_p12, %p894_p1  ;;  %p930_p4 = por %p929_p2, %p928_p0 }
  0x39   : > { %p926_p10 = pneg %p925_p8  ;;  %p932_p7 = por %p931_p5, %p930_p4 }
  0x3b   : > { %p933_p9 = pnand %p932_p7, %p926_p10 }
  0x3d   : > { %936 = shalt.err (!%p933_p9)
}
  0x3e   : > { %s937_s9 = scalar_lea.vmem %s1171_s27, 6144  ;;  %s1027_s11 = smov [#allocation5]  }
  0x3f   : > { %p938_p3 = scmp.ne.s32.totalorder %s1171_s27, %s937_s9  ;;  %s942_s17 = sshll.u32 %s1027_s11, 4  ;;  %s943_s17 = int_to_ptr.vmem [resolvable:$false] %s942_s17 }
  0x40   : > { %s944_s19 = scalar_lea.vmem %s943_s17, 12288  ;;  %p945_p6 = scmp.lt.s32.totalorder %s1171_s27, %s943_s17 }
  0x41   : > { %p940_p12 = pnand %p938_p3, %p894_p1  ;;  %p946_p0 = scmp.lt.s32.totalorder %s944_s19, %s937_s9 }
  0x43   : > { %p941_p8 = pneg %p940_p12  ;;  %p947_p2 = por %p946_p0, %p945_p6 }
  0x45   : > { %p948_p4 = pnand %p947_p2, %p941_p8 }
  0x47   : > { %951 = shalt.err (!%p948_p4)
}
  0x48   : > { %s1028_s22 = smov 384   ;;  %s1029_s6 = smov 24  }
  0x49   : > { %846 = dma.hbm_to_vmem [thread:$0]  (!%p1124_p13), %s1169_s20, 6144, %s1171_s27, %s166_s4, %s1028_s22, %s1028_s22, %s1029_s6  }
  0x4a   : > { %195 = sbr.rel (%p1161_p11) target bundleno = 379 (0x17b), region = 32  ;;  %s1202_s8 = sand.u32 (!%p1161_p11), 1, %s1014_s13  }
  0x4b   : > { %s691_s28 = sshll.u32 (!%p1161_p11), %s1202_s8, 6  ;;  %s198_s29 = scalar_lea.sflag (!%p1161_p11), [#allocation3], %s1202_s8 }
  0x4c   : > { %s1206_s30 = scalar_lea.vmem (!%p1161_p11), [#allocation2], %s691_s28  ;;  %p1399_p6 = scmp.ne.s32.totalorder (!%p1161_p11), %s1394_s23, 0 }
  0x51   : > { %997 = dma.done.wait (%p1399_p6), %s198_s29, 1024  }
  0x52   : > { %999 = vsyncadd (%p1399_p6), %s198_s29, 4294966272  ;;  %s830_s26 = smul.u32 384, %s1202_s8  ;;  %s207_s7 = scalar_lea.sflag [#allocation6], %s1202_s8 }
  0x54   : > { %s1214_s10 = scalar_lea.vmem [#allocation5], %s830_s26 }
  0x55   : > { %1001 = dma.done.wait (%p1399_p6), %s207_s7, 6144  }
  0x56   : > { %1003 = vsyncadd (%p1399_p6), %s207_s7, 4294961152  ;;  %v1030_v0 = vmov 0.0   ;;  %v255_v1 = vld [vmem:[%s1214_s10 + $0x8] sm:$0xff]  ;;  %v258_v2 = vld [vmem:[%s1214_s10 + $0x20] sm:$0xff]  ;;  %p242_p13 = scmp.lt.s32.totalorder %s1075_s16, 1  ;;  %s831_s9 = smul.u32 192, %s1202_s8 }
  0x57   : > { %383 = vmatprep.mubr.f32.mxu0 %v1030_v0  ;;  %v254_v3 = vld [vmem:[%s1214_s10] sm:$0xff]  ;;  %v764_v4 = vpack.c.bf16 %v258_v2, %v255_v1  ;;  %v257_v5 = vld [vmem:[%s1214_s10 + $0x18] sm:$0xff]  ;;  %v264_v7 = vld [vmem:[%s1214_s10 + $0x50] sm:$0xff]  ;;  %s833_s17 = smul.u32 3072, %s1075_s16  ;;  %p1400_p11 = scmp.ne.s32.totalorder %s1395_s24, 0 }
  0x58   : > { %v261_v6 = vld [vmem:[%s1214_s10 + $0x38] sm:$0xff]  ;;  %v766_v8 = vpack.c.bf16 %v257_v5, %v254_v3  ;;  %v260_v10 = vld [vmem:[%s1214_s10 + $0x30] sm:$0xff]  ;;  %v263_v11 = vld [vmem:[%s1214_s10 + $0x48] sm:$0xff]  ;;  %s243_s23 = scalar_select %p242_p13, %s1075_s16, 1 }
  0x59   : > { %v768_v9 = vpack.c.bf16 %v264_v7, %v261_v6  ;;  %v267_v12 = vld [vmem:[%s1214_s10 + $0x68] sm:$0xff]  ;;  %765 = vmatprep.subr.bf16.mxu0 %v764_v4  ;;  %v270_v13 = vld [vmem:[%s1214_s10 + $0x80] sm:$0xff]  ;;  %v770_v14 = vpack.c.bf16 %v263_v11, %v260_v10  ;;  %v269_v17 = vld [vmem:[%s1214_s10 + $0x78] sm:$0xff]  ;;  %s1296_s11 = scalar_lea.vmem [#allocation7], %s831_s9  ;;  %s1338_s28 = scalar_lea.hbm %s1390_s3, %s833_s17 }
  0x5a   : > { %767 = vmatpush1.bf16.msra.mxu0 %v766_v8  ;;  %v266_v15 = vld [vmem:[%s1214_s10 + $0x60] sm:$0xff]  ;;  %v772_v16 = vpack.c.bf16 %v270_v13, %v267_v12  ;;  %v256_v18 = vld [vmem:[%s1214_s10 + $0x10] sm:$0xff]  ;;  %v259_v19 = vld [vmem:[%s1214_s10 + $0x28] sm:$0xff]  ;;  %s832_s20 = smul.u32 3, %s243_s23  ;;  %s575_s19 = sshll.u32 %s1296_s11, 4  ;;  %s1340_s19 = int_to_ptr.vmem [resolvable:$true] %s575_s19 }
  0x5b   : > { %769 = vmatprep.subr.bf16.mxu0 %v768_v9  ;;  %v273_v20 = vld [vmem:[%s1214_s10 + $0x98] sm:$0xff]  ;;  %v276_v21 = vld [vmem:[%s1214_s10 + $0xb0] sm:$0xff]  ;;  %v796_v22 = vpack.c.bf16 %v259_v19, %v256_v18  ;;  %v262_v23 = vld [vmem:[%s1214_s10 + $0x40] sm:$0xff]  ;;  %v774_v25 = vpack.c.bf16 %v269_v17, %v266_v15  ;;  %v304_v18 = vlaneseq  ;;  %s562_s16 = scalar_lea.sflag [#allocation4], %s1202_s8  ;;  %s952_s29 = scalar_lea.vmem %s1340_s19, 3072 }
  0x5c   : > { %v265_v24 = vld [vmem:[%s1214_s10 + $0x58] sm:$0xff]  ;;  %v272_v26 = vld [vmem:[%s1214_s10 + $0x90] sm:$0xff]  ;;  %v776_v28 = vpack.c.bf16 %v276_v21, %v273_v20  ;;  %v275_v29 = vld [vmem:[%s1214_s10 + $0xa8] sm:$0xff]  ;;  %s245_s5 = scalar_lea.vmem %s1389_s2, %s832_s20  ;;  %p953_p1 = scmp.ne.s32.totalorder %s1340_s19, %s952_s29 }
  0x5d   : > { %797 = vmatprep.subr.bf16.mxu1 %v796_v22  ;;  %v800_v27 = vpack.c.bf16 %v265_v24, %v262_v23  ;;  %v268_v30 = vld [vmem:[%s1214_s10 + $0x70] sm:$0xff]  ;;  %v271_v31 = vld [vmem:[%s1214_s10 + $0x88] sm:$0xff]  ;;  %v282_v33 = vld [vmem:[%s1214_s10 + $0xe0] sm:$0xff]  ;;  %v778_v37 = vpack.c.bf16 %v275_v29, %v272_v26  ;;  %v305_v19 = vshrl.u32 %v304_v18, 7 }
  0x5e   : > { %771 = vmatpush1.bf16.msra.mxu0 %v770_v14  ;;  %799 = vmatpush3.bf16.msra.mxu1 %v796_v22  ;;  %v279_v32 = vld [vmem:[%s1214_s10 + $0xc8] sm:$0xff]  ;;  %v804_v34 = vpack.c.bf16 %v271_v31, %v268_v30  ;;  %v274_v35 = vld [vmem:[%s1214_s10 + $0xa0] sm:$0xff]  ;;  %v277_v36 = vld [vmem:[%s1214_s10 + $0xb8] sm:$0xff]  ;;  %p954_p10 = pnand %p953_p1, %p1400_p11 }
  0x5f   : > { %773 = vmatprep.subr.bf16.mxu0 %v772_v16  ;;  %801 = vmatprep.subr.bf16.mxu1 %v800_v27  ;;  %v780_v38 = vpack.c.bf16 %v282_v33, %v279_v32  ;;  %v278_v39 = vld [vmem:[%s1214_s10 + $0xc0] sm:$0xff]  ;;  %v281_v40 = vld [vmem:[%s1214_s10 + $0xd8] sm:$0xff]  ;;  %v288_v42 = vld [vmem:[%s1214_s10 + $0x110] sm:$0xff]  ;;  %v808_v43 = vpack.c.bf16 %v277_v36, %v274_v35  ;;  %v306_v20 = vsub.s32 0, %v305_v19  ;;  %v310_v22 = vsub.s32 1, %v305_v19 }
  0x60   : > { %v285_v41 = vld [vmem:[%s1214_s10 + $0xf8] sm:$0xff]  ;;  %v246_v44 = vld [vmem:[%s1206_s30] sm:$0xff]  ;;  %v280_v45 = vld [vmem:[%s1214_s10 + $0xd0] sm:$0xff]  ;;  %v782_v47 = vpack.c.bf16 %v281_v40, %v278_v39  ;;  %p955_p5 = pneg %p954_p10 }
  0x61   : > { %v283_v46 = vld [vmem:[%s1214_s10 + $0xe8] sm:$0xff]  ;;  %752 = vmatprep.mubr.f32.mxu1 %v246_v44  ;;  %v784_v48 = vpack.c.bf16 %v288_v42, %v285_v41  ;;  %v284_v49 = vld [vmem:[%s1214_s10 + $0xf0] sm:$0xff]  ;;  %v294_v52 = vld [vmem:[%s1214_s10 + $0x140] sm:$0xff] }
  0x62   : > { %775 = vmatpush1.bf16.msra.mxu0 %v774_v25  ;;  %803 = vmatpush3.bf16.msra.mxu1 %v800_v27  ;;  %v287_v50 = vld [vmem:[%s1214_s10 + $0x108] sm:$0xff]  ;;  %v812_v53 = vpack.c.bf16 %v283_v46, %v280_v45  ;;  %v286_v54 = vld [vmem:[%s1214_s10 + $0x100] sm:$0xff]  ;;  %v289_v55 = vld [vmem:[%s1214_s10 + $0x118] sm:$0xff]  ;;  %v314_v25 = vsub.s32 2, %v305_v19 }
  0x63   : > { %777 = vmatprep.subr.bf16.mxu0 %v776_v28  ;;  %805 = vmatprep.subr.bf16.mxu1 %v804_v34  ;;  %v291_v51 = vld [vmem:[%s1214_s10 + $0x128] sm:$0xff]  ;;  %v786_v56 = vpack.c.bf16 %v287_v50, %v284_v49  ;;  %v290_v58 = vld [vmem:[%s1214_s10 + $0x120] sm:$0xff]  ;;  %v293_v59 = vld [vmem:[%s1214_s10 + $0x138] sm:$0xff]  ;;  %v816_v62 = vpack.c.bf16 %v289_v55, %v286_v54 }
  0x64   : > { %v788_v57 = vpack.c.bf16 %v294_v52, %v291_v51  ;;  %v297_v60 = vld [vmem:[%s1214_s10 + $0x158] sm:$0xff]  ;;  %v300_v61 = vld [vmem:[%s1214_s10 + $0x170] sm:$0xff]  ;;  %v295_v1 = vld [vmem:[%s1214_s10 + $0x148] sm:$0xff]  ;;  %v790_v2 = vpack.c.bf16 %v293_v59, %v290_v58 }
  0x65   : > { %v292_v63 = vld [vmem:[%s1214_s10 + $0x130] sm:$0xff]  ;;  %v792_v3 = vpack.c.bf16 %v300_v61, %v297_v60  ;;  %v299_v5 = vld [vmem:[%s1214_s10 + $0x168] sm:$0xff]  ;;  %v298_v7 = vld [vmem:[%s1214_s10 + $0x160] sm:$0xff] }
  0x66   : > { %779 = vmatpush1.bf16.msra.mxu0 %v778_v37  ;;  %807 = vmatpush3.bf16.msra.mxu1 %v804_v34  ;;  %v296_v4 = vld [vmem:[%s1214_s10 + $0x150] sm:$0xff]  ;;  %v820_v6 = vpack.c.bf16 %v295_v1, %v292_v63  ;;  %v301_v8 = vld [vmem:[%s1214_s10 + $0x178] sm:$0xff]  ;;  %v247_v11 = vld [vmem:[%s1206_s30 + $0x8] sm:$0xff] }
  0x67   : > { %781 = vmatprep.subr.bf16.mxu0 %v780_v38  ;;  %809 = vmatprep.subr.bf16.mxu1 %v808_v43  ;;  %v794_v9 = vpack.c.bf16 %v299_v5, %v296_v4  ;;  %v824_v10 = vpack.c.bf16 %v301_v8, %v298_v7  ;;  %v248_v12 = vld [vmem:[%s1206_s30 + $0x10] sm:$0xff]  ;;  %v249_v13 = vld [vmem:[%s1206_s30 + $0x18] sm:$0xff]  ;;  %v250_v14 = vld [vmem:[%s1206_s30 + $0x20] sm:$0xff] }
  0x68   : > { %v251_v15 = vld [vmem:[%s1206_s30 + $0x28] sm:$0xff]  ;;  %v252_v16 = vld [vmem:[%s1206_s30 + $0x30] sm:$0xff]  ;;  %v253_v17 = vld [vmem:[%s1206_s30 + $0x38] sm:$0xff]  ;;  %s1031_s30 = smov [#allocation7]  }
  0x69   : > { %v302_v21 = vld [vmem:[%s245_s5] sm:$0x7]  ;;  %s956_s26 = sshll.u32 %s1031_s30, 4  ;;  %s957_s26 = int_to_ptr.vmem [resolvable:$false] %s956_s26 }
  0x6a   : > { %783 = vmatpush1.bf16.msra.mxu0 %v782_v47  ;;  %811 = vmatpush3.bf16.msra.mxu1 %v808_v43  ;;  %v1290_v23 = vrot.slane %v302_v21, %v306_v20  ;;  %v1292_v24 = vrot.slane %v302_v21, %v310_v22  ;;  %v315_v29 = vrot.slane %v302_v21, %v314_v25  ;;  %s958_s7 = scalar_lea.vmem %s957_s26, 6144  ;;  %p959_p7 = scmp.lt.s32.totalorder %s1340_s19, %s957_s26 }
  0x6b   : > { %785 = vmatprep.subr.bf16.mxu0 %v784_v48  ;;  %813 = vmatprep.subr.bf16.mxu1 %v812_v53  ;;  %p960_p9 = scmp.lt.s32.totalorder %s958_s7, %s952_s29 }
  0x6d   : > { %p961_p3 = por %p960_p9, %p959_p7 }
  0x6e   : > { %787 = vmatpush1.bf16.msra.mxu0 %v786_v56  ;;  %815 = vmatpush3.bf16.msra.mxu1 %v812_v53 }
  0x6f   : > { %789 = vmatprep.subr.bf16.mxu0 %v788_v57  ;;  %817 = vmatprep.subr.bf16.mxu1 %v816_v62  ;;  %p962_p12 = pnand %p961_p3, %p955_p5 }
  0x72   : > { %791 = vmatpush1.bf16.msra.mxu0 %v790_v2  ;;  %819 = vmatpush3.bf16.msra.mxu1 %v816_v62 }
  0x73   : > { %793 = vmatprep.subr.bf16.mxu0 %v792_v3  ;;  %821 = vmatprep.subr.bf16.mxu1 %v820_v6 }
  0x76   : > { %795 = vmatpush1.bf16.msra.mxu0 %v794_v9  ;;  %823 = vmatpush3.bf16.msra.mxu1 %v820_v6 }
  0x77   : > { %825 = vmatprep.subr.bf16.mxu1 %v824_v10 }
  0x79   : > { %384 = vmatmul.mubr.f32.vlgmr.msra.gmra.mrb[0].mxu0 %v246_v44 }
  0x7a   : > { %389 = vmatprep.mubr.f32.mxu0 %v1030_v0  ;;  %827 = vmatpush3.bf16.msra.mxu1 %v824_v10 }
  0x7d   : > { %390 = vmatmul.mubr.f32.gmra.mrb[2].mxu0 %v247_v11  ;;  %753 = vmatmul.mubr.f32.vlgmr.msra.gmra.mrb[0].mxu1 %v247_v11 }
  0x7e   : > { %395 = vmatprep.mubr.f32.mxu0 %v1030_v0  ;;  %755 = vmatprep.mubr.f32.mxu1 %v248_v12 }
  0x81   : > { %396 = vmatmul.mubr.f32.gmra.mrb[4].mxu0 %v248_v12  ;;  %756 = vmatmul.mubr.f32.gmra.mrb[2].mxu1 %v249_v13 }
  0x82   : > { %401 = vmatprep.mubr.f32.mxu0 %v1030_v0  ;;  %758 = vmatprep.mubr.f32.mxu1 %v250_v14 }
  0x85   : > { %402 = vmatmul.mubr.f32.gmra.mrb[6].mxu0 %v249_v13  ;;  %759 = vmatmul.mubr.f32.gmra.mrb[4].mxu1 %v251_v15 }
  0x86   : > { %407 = vmatprep.mubr.f32.mxu0 %v1030_v0  ;;  %761 = vmatprep.mubr.f32.mxu1 %v252_v16 }
  0x89   : > { %408 = vmatmul.mubr.f32.gmra.mrb[8].mxu0 %v250_v14  ;;  %762 = vmatmul.mubr.f32.gmra.mrb[6].mxu1 %v253_v17 }
  0x8a   : > { %413 = vmatprep.mubr.f32.mxu0 %v1030_v0 }
  0x8d   : > { %414 = vmatmul.mubr.f32.gmra.mrb[10].mxu0 %v251_v15 }
  0x8e   : > { %419 = vmatprep.mubr.f32.mxu0 %v1030_v0 }
  0x91   : > { %420 = vmatmul.mubr.f32.gmra.mrb[12].mxu0 %v252_v16 }
  0x92   : > { %425 = vmatprep.mubr.f32.mxu0 %v1030_v0 }
  0x95   : > { %426 = vmatmul.mubr.f32.gmra.mrb[14].mxu0 %v253_v17 }
 0x14c   : > { %v385_v0 = vpop.f32.mrb[0].mxu0 }
 0x14d   : > { %v386_v26 = vadd.f32 %v385_v0, %v1290_v23  ;;  %v387_v27 = vpop.f32.mrb[1].mxu0 }
 0x14e   : > { %v388_v28 = vadd.f32 %v387_v27, %v1292_v24 }
 0x14f   : > { %537 = vst [vmem:[%s1296_s11] sm:$0xff] %v386_v26 }
 0x150   : > { %538 = vst [vmem:[%s1296_s11 + $0x8] sm:$0xff] %v388_v28  ;;  %v391_v30 = vpop.f32.mrb[2].mxu0  ;;  %v754_v33 = vpop.f32.mrb[0].mxu1 }
 0x151   : > { %v392_v31 = vadd.f32 %v391_v30, %v1290_v23  ;;  %v393_v32 = vpop.f32.mrb[3].mxu0  ;;  %v504_v35 = vadd.f32 %v754_v33, %v315_v29  ;;  %v498_v36 = vpop.f32.mrb[1].mxu1 }
 0x152   : > { %v394_v34 = vadd.f32 %v393_v32, %v1292_v24  ;;  %v499_v37 = vadd.f32 %v498_v36, %v315_v29 }
 0x153   : > { %540 = vst [vmem:[%s1296_s11 + $0x18] sm:$0xff] %v392_v31  ;;  %542 = vst [vmem:[%s1296_s11 + $0x28] sm:$0xff] %v504_v35 }
 0x154   : > { %541 = vst [vmem:[%s1296_s11 + $0x20] sm:$0xff] %v394_v34  ;;  %v397_v38 = vpop.f32.mrb[4].mxu0  ;;  %539 = vst [vmem:[%s1296_s11 + $0x10] sm:$0xff] %v499_v37  ;;  %v757_v41 = vpop.f32.mrb[2].mxu1 }
 0x155   : > { %v398_v39 = vadd.f32 %v397_v38, %v1290_v23  ;;  %v399_v40 = vpop.f32.mrb[5].mxu0  ;;  %v514_v43 = vadd.f32 %v757_v41, %v315_v29  ;;  %v508_v44 = vpop.f32.mrb[3].mxu1 }
 0x156   : > { %v400_v42 = vadd.f32 %v399_v40, %v1292_v24  ;;  %v509_v45 = vadd.f32 %v508_v44, %v315_v29 }
 0x157   : > { %543 = vst [vmem:[%s1296_s11 + $0x30] sm:$0xff] %v398_v39  ;;  %548 = vst [vmem:[%s1296_s11 + $0x58] sm:$0xff] %v514_v43 }
 0x158   : > { %544 = vst [vmem:[%s1296_s11 + $0x38] sm:$0xff] %v400_v42  ;;  %v403_v46 = vpop.f32.mrb[6].mxu0  ;;  %545 = vst [vmem:[%s1296_s11 + $0x40] sm:$0xff] %v509_v45  ;;  %v760_v49 = vpop.f32.mrb[4].mxu1 }
 0x159   : > { %v404_v47 = vadd.f32 %v403_v46, %v1290_v23  ;;  %v405_v48 = vpop.f32.mrb[7].mxu0  ;;  %v524_v51 = vadd.f32 %v760_v49, %v315_v29  ;;  %v518_v52 = vpop.f32.mrb[5].mxu1 }
 0x15a   : > { %v406_v50 = vadd.f32 %v405_v48, %v1292_v24  ;;  %v519_v53 = vadd.f32 %v518_v52, %v315_v29 }
 0x15b   : > { %546 = vst [vmem:[%s1296_s11 + $0x48] sm:$0xff] %v404_v47  ;;  %554 = vst [vmem:[%s1296_s11 + $0x88] sm:$0xff] %v524_v51 }
 0x15c   : > { %547 = vst [vmem:[%s1296_s11 + $0x50] sm:$0xff] %v406_v50  ;;  %v409_v54 = vpop.f32.mrb[8].mxu0  ;;  %551 = vst [vmem:[%s1296_s11 + $0x70] sm:$0xff] %v519_v53  ;;  %v763_v57 = vpop.f32.mrb[6].mxu1 }
 0x15d   : > { %v410_v55 = vadd.f32 %v409_v54, %v1290_v23  ;;  %v411_v56 = vpop.f32.mrb[9].mxu0  ;;  %v534_v59 = vadd.f32 %v763_v57, %v315_v29  ;;  %v528_v60 = vpop.f32.mrb[7].mxu1 }
 0x15e   : > { %v412_v58 = vadd.f32 %v411_v56, %v1292_v24  ;;  %v529_v61 = vadd.f32 %v528_v60, %v315_v29 }
 0x15f   : > { %549 = vst [vmem:[%s1296_s11 + $0x60] sm:$0xff] %v410_v55  ;;  %560 = vst [vmem:[%s1296_s11 + $0xb8] sm:$0xff] %v534_v59 }
 0x160   : > { %550 = vst [vmem:[%s1296_s11 + $0x68] sm:$0xff] %v412_v58  ;;  %v415_v62 = vpop.f32.mrb[10].mxu0  ;;  %557 = vst [vmem:[%s1296_s11 + $0xa0] sm:$0xff] %v529_v61 }
 0x161   : > { %v416_v63 = vadd.f32 %v415_v62, %v1290_v23  ;;  %v417_v1 = vpop.f32.mrb[11].mxu0 }
 0x162   : > { %v418_v2 = vadd.f32 %v417_v1, %v1292_v24 }
 0x163   : > { %552 = vst [vmem:[%s1296_s11 + $0x78] sm:$0xff] %v416_v63 }
 0x164   : > { %553 = vst [vmem:[%s1296_s11 + $0x80] sm:$0xff] %v418_v2  ;;  %v421_v3 = vpop.f32.mrb[12].mxu0 }
 0x165   : > { %v422_v4 = vadd.f32 %v421_v3, %v1290_v23  ;;  %v423_v5 = vpop.f32.mrb[13].mxu0 }
 0x166   : > { %v424_v6 = vadd.f32 %v423_v5, %v1292_v24 }
 0x167   : > { %555 = vst [vmem:[%s1296_s11 + $0x90] sm:$0xff] %v422_v4 }
 0x168   : > { %556 = vst [vmem:[%s1296_s11 + $0x98] sm:$0xff] %v424_v6  ;;  %v427_v7 = vpop.f32.mrb[14].mxu0 }
 0x169   : > { %v428_v8 = vadd.f32 %v427_v7, %v1290_v23  ;;  %v429_v9 = vpop.f32.mrb[15].mxu0 }
 0x16a   : > { %v430_v10 = vadd.f32 %v429_v9, %v1292_v24 }
 0x16b   : > { %558 = vst [vmem:[%s1296_s11 + $0xa8] sm:$0xff] %v428_v8 }
 0x16c   : > { %559 = vst [vmem:[%s1296_s11 + $0xb0] sm:$0xff] %v430_v10 }
 0x16d   : > { %965 = shalt.err (!%p962_p12)
}
 0x16e   : > { %s966_s10 = scalar_lea.hbm %s1338_s28, 3072  ;;  %s970_s27 = scalar_lea.hbm %s1390_s3, 6144 }
 0x16f   : > { %p967_p8 = scmp.ne.s32.totalorder %s1338_s28, %s966_s10  ;;  %p971_p4 = scmp.lt.u32.totalorder %s1338_s28, %s1390_s3 }
 0x170   : > { %p972_p6 = scmp.lt.u32.totalorder %s970_s27, %s966_s10  ;;  %p974_p1 = scmp.lt.u32.totalorder %s966_s10, %s1338_s28 }
 0x171   : > { %p968_p0 = pnand %p967_p8, %p1400_p11 }
 0x172   : > { %p973_p13 = por %p972_p6, %p971_p4 }
 0x173   : > { %p969_p2 = pneg %p968_p0 }
 0x174   : > { %p975_p10 = por %p974_p1, %p973_p13 }
 0x176   : > { %p976_p5 = pnand %p975_p10, %p969_p2 }
 0x178   : > { %979 = shalt.err (!%p976_p5)
}
 0x179   : > { %s1032_s9 = smov 384   ;;  %s1033_s11 = smov 24  }
 0x17a   : > { %838 = dma.vmem_to_hbm [thread:$0]  (%p1400_p11), %s1340_s19, 3072, %s1338_s28, %s562_s16, %s1032_s9, %s1032_s9, %s1033_s11  }
 0x17b PF: > { %s590_s17 = sand.u32 1, %s1010_s12   ;;  %p1401_p7 = scmp.ne.s32.totalorder %s1396_s25, 0 }
 0x17c   : > { %p1402_p9 = scmp.ge.s32.totalorder %s1022_s15, 2  ;;  %s591_s22 = scalar_lea.sflag [#allocation4], %s590_s17 }
 0x17e   : > { %p848_p3 = pnand %p1402_p9, %p1401_p7 }
 0x180   : > { %1005 = dma.done.wait (!%p848_p3), %s591_s22, 3072  }
 0x181   : > { %1007 = vsyncadd (!%p848_p3), %s591_s22, 4294964224  ;;  %p19_p12 = scmp.ge.s32.totalorder %s1079_s18, 4   ;;  %s1403_s12 = smov %s1014_s13 }
 0x182   : > { %s1404_s13 = smov %s1018_s14  ;;  %s1405_s14 = smov %s1091_s21 }
 0x183   : > { %s1406_s15 = smov %s1079_s18  ;;  %21 = sbr.rel (!%p19_p12) target bundleno = 7 (0x7), region = 93 }
 0x18a   :  { %596 = vsyncpa [#allocation3], 1 }
 0x18b   :  { %598 = vsyncpa [#allocation3 + $0x1], 1 }
 0x18c   :  { %599 = vsyncpa [#allocation6], 1 }
 0x18d   :  { %601 = vsyncpa [#allocation6 + $0x1], 1 }
 0x18e   :  { %602 = vsyncpa [#allocation4], 1 }
 0x18f   :  { %604 = vsyncpa [#allocation4 + $0x1], 1 }

</bundles_post_ra>
